<compile_context>
chip_gen: v7x
topology: tpu7x:2x2x1
jax: 0.10.0
libtpu: 0.0.40
codegen_flags: <defaults>
</compile_context>

<pallas_src>
import functools

import jax
import jax.numpy as jnp
from jax.experimental import pallas as pl
from jax.experimental.pallas import tpu as pltpu


def _round_up(x, m):
    return (x + m - 1) // m * m


# ----------------------------------------------------------------------------
# Pallas kernel: one SAGEConv('mean') layer, tiled over (dst tiles, src tiles)
# ----------------------------------------------------------------------------
def _sage_kernel(x_src_ref, x_dst_ref, adj_ref, w_self_ref, w_neigh_ref, b_ref,
                 out_ref, acc_ref, *, feat_col, apply_relu):
    k = pl.program_id(1)

    @pl.when(k == 0)
    def _():
        acc_ref[...] = jnp.zeros_like(acc_ref)

    # Accumulate [sum of neighbour feats | in-degree] in one MXU matmul:
    # x_src has a ones column at `feat_col`, so adj @ x_src also yields degree.
    acc_ref[...] += jnp.dot(adj_ref[...], x_src_ref[...],
                            preferred_element_type=jnp.float32)

    @pl.when(k == pl.num_programs(1) - 1)
    def _():
        acc = acc_ref[...]                                        # (tm, F_pad) f32
        deg = jnp.maximum(acc[:, feat_col:feat_col + 1], 1.0)     # (tm, 1)
        h_neigh = acc * pl.reciprocal(deg, approx=True)           # mean aggregation

        out = (jnp.dot(x_dst_ref[...], w_self_ref[...],
                       preferred_element_type=jnp.float32)
               + jnp.dot(h_neigh.astype(w_neigh_ref.dtype), w_neigh_ref[...],
                         preferred_element_type=jnp.float32)
               + b_ref[...])
        if apply_relu:
            out = jnp.maximum(out, 0.0)                           # activation = ReLU
        out_ref[...] = out


# ----------------------------------------------------------------------------
# Wrapper: padding, bf16 casting, tiled pallas_call
# ----------------------------------------------------------------------------
def sage_conv(x, adj, w_self, w_neigh, b, *, apply_relu, tm=256, tk=512):
    n_dst, n_src = adj.shape
    f_in = x.shape[1]
    out_dim = w_self.shape[1]

    # Tile sizes: sublane (tm) multiple of 8, lane (tk) multiple of 128.
    tm = min(tm, _round_up(n_dst, 8))
    tk = min(tk, _round_up(n_src, 128))

    f_pad = _round_up(f_in + 1, 128)       # +1 -> fused ones/degree column
    o_pad = _round_up(out_dim, 128)        # lane-dense output stores
    n_dst_pad = _round_up(n_dst, tm)
    n_src_pad = _round_up(n_src, tk)
    n_pad = max(n_dst_pad, n_src_pad)

    # Padded, lane-dense feature matrix with a ones column for in-degree.
    x_pad = jnp.zeros((n_pad, f_pad), jnp.float32)
    x_pad = x_pad.at[:n_src, :f_in].set(x[:n_src])
    x_pad = x_pad.at[:, f_in].set(1.0)
    x_pad = x_pad.astype(jnp.bfloat16)

    adj_pad = jnp.zeros((n_dst_pad, n_src_pad), jnp.float32)
    adj_pad = adj_pad.at[:n_dst, :n_src].set(adj)
    adj_pad = adj_pad.astype(jnp.bfloat16)          # 0/1 exact in bf16

    w_self_pad = jnp.zeros((f_pad, o_pad), jnp.bfloat16)
    w_self_pad = w_self_pad.at[:f_in, :out_dim].set(w_self.astype(jnp.bfloat16))
    w_neigh_pad = jnp.zeros((f_pad, o_pad), jnp.bfloat16)
    w_neigh_pad = w_neigh_pad.at[:f_in, :out_dim].set(w_neigh.astype(jnp.bfloat16))
    b_pad = jnp.zeros((1, o_pad), jnp.float32)
    b_pad = b_pad.at[:, :out_dim].set(b.reshape(1, out_dim))

    grid = (n_dst_pad // tm, n_src_pad // tk)

    flops = (2 * n_dst_pad * n_src_pad * f_pad            # aggregation
             + 2 * 2 * n_dst_pad * f_pad * o_pad)         # two projections
    bytes_accessed = (n_dst_pad * n_src_pad * 2                       # adj
                      + grid[0] * n_src_pad * f_pad * 2               # x_src reuse
                      + n_dst_pad * f_pad * 2                         # x_dst
                      + 2 * f_pad * o_pad * 2                         # weights
                      + n_dst_pad * o_pad * 4)                        # output

    out_pad = pl.pallas_call(
        functools.partial(_sage_kernel, feat_col=f_in, apply_relu=apply_relu),
        out_shape=jax.ShapeDtypeStruct((n_dst_pad, o_pad), jnp.float32),
        grid_spec=pltpu.PrefetchScalarGridSpec(
            num_scalar_prefetch=0,
            grid=grid,
            in_specs=[
                pl.BlockSpec((tk, f_pad), lambda i, k: (k, 0)),       # x_src tile
                pl.BlockSpec((tm, f_pad), lambda i, k: (i, 0)),       # x_dst tile
                pl.BlockSpec((tm, tk), lambda i, k: (i, k)),          # adj tile
                pl.BlockSpec((f_pad, o_pad), lambda i, k: (0, 0)),    # W_self
                pl.BlockSpec((f_pad, o_pad), lambda i, k: (0, 0)),    # W_neigh
                pl.BlockSpec((1, o_pad), lambda i, k: (0, 0)),        # bias
            ],
            out_specs=pl.BlockSpec((tm, o_pad), lambda i, k: (i, 0)),
            scratch_shapes=[pltpu.VMEM((tm, f_pad), jnp.float32)],    # accumulator
        ),
        compiler_params=pltpu.CompilerParams(
            dimension_semantics=("parallel", "arbitrary")),
        cost_estimate=pl.CostEstimate(flops=flops, transcendentals=0,
                                      bytes_accessed=bytes_accessed),
    )(x_pad, x_pad, adj_pad, w_self_pad, w_neigh_pad, b_pad)

    return out_pad[:n_dst, :out_dim]


# ----------------------------------------------------------------------------
# DistSAGE forward (glue in plain JAX)
# ----------------------------------------------------------------------------
def dist_sage_forward(params, adjs, x):
    h = x
    n_layers = len(params)
    for i, (p, adj) in enumerate(zip(params, adjs)):
        last = (i == n_layers - 1)
        n_src = adj.shape[1]
        h = sage_conv(h[:n_src], adj, p["w_self"], p["w_neigh"], p["b"],
                      apply_relu=not last)      # activation fused (skip on last)
        # dropout between layers: identity (eval mode) -- see TODO above.
    return h


# ----------------------------------------------------------------------------
# Main
# ----------------------------------------------------------------------------
if __name__ == "__main__":
    key = jax.random.PRNGKey(0)

    in_feats, n_hidden, n_classes, n_layers = 32, 16, 8, 3
    # nodes per "block": layer i aggregates N_src=node_counts[i] -> N_dst=node_counts[i+1]
    node_counts = [64, 32, 16, 8]

    # ---------------- deterministic parameters ----------------
    params = []
    for i in range(n_layers):
        in_dim = in_feats if i == 0 else n_hidden
        out_dim = n_classes if i == n_layers - 1 else n_hidden
        k = jax.random.split(jax.random.fold_in(key, i), 3)
        params.append({
            "w_self": 0.1 * jax.random.normal(k[0], (in_dim, out_dim), jnp.float32),
            "w_neigh": 0.1 * jax.random.normal(k[1], (in_dim, out_dim), jnp.float32),
            "b": 0.01 * jax.random.normal(k[2], (out_dim,), jnp.float32),
        })

    # ---------------- deterministic graph blocks + features ----------------
    adjs = []
    for i in range(n_layers):
        akey = jax.random.fold_in(key, 100 + i)
        adjs.append(jax.random.bernoulli(
            akey, p=0.4,
            shape=(node_counts[i + 1], node_counts[i])).astype(jnp.float32))

    x = jax.random.normal(jax.random.fold_in(key, 999),
                          (node_counts[0], in_feats), jnp.float32)

    out = jax.jit(dist_sage_forward)(params, adjs, x)
    out = jax.block_until_ready(out)

    assert out.shape == (node_counts[-1], n_classes), out.shape
    assert bool(jnp.all(jnp.isfinite(out)))
    print("KERNEL_OK")
</pallas_src>

<mosaic_0001>
module attributes {stable_mosaic.version = 11 : i64} {
  func.func @_sage_kernel(%arg0: i32, %arg1: i32, %arg2: memref<128x128xbf16, #tpu.memory_space<vmem>>, %arg3: memref<32x128xbf16, #tpu.memory_space<vmem>>, %arg4: memref<32x128xbf16, #tpu.memory_space<vmem>>, %arg5: memref<128x128xbf16, #tpu.memory_space<vmem>>, %arg6: memref<128x128xbf16, #tpu.memory_space<vmem>>, %arg7: memref<1x128xf32, #tpu.memory_space<vmem>>, %arg8: memref<32x128xf32, #tpu.memory_space<vmem>>, %arg9: memref<32x128xf32, #tpu.memory_space<vmem>>) attributes {dimension_semantics = [#tpu.dimension_semantics<parallel>, #tpu.dimension_semantics<arbitrary>], iteration_bounds = array<i64: 1, 1>, scalar_prefetch = 0 : i64, scratch_operands = 1 : i64, tpu.core_type = #tpu.core_type<tc>, window_params = [{transform_indices = @transform_0, window_bounds = array<i64: 128, 128>}, {transform_indices = @transform_1, window_bounds = array<i64: 32, 128>}, {transform_indices = @transform_2, window_bounds = array<i64: 32, 128>}, {pipeline_mode = #tpu.pipeline_mode<synchronous>, transform_indices = @transform_3, window_bounds = array<i64: 128, 128>}, {pipeline_mode = #tpu.pipeline_mode<synchronous>, transform_indices = @transform_4, window_bounds = array<i64: 128, 128>}, {pipeline_mode = #tpu.pipeline_mode<synchronous>, transform_indices = @transform_5, window_bounds = array<i64: 1, 128>}, {transform_indices = @transform_6, window_bounds = array<i64: 32, 128>}]} {
    %c0_i32 = arith.constant 0 : i32
    %0 = arith.cmpi eq, %arg1, %c0_i32 : i32
    %1 = arith.extui %0 : i1 to i32
    %c0_i32_0 = arith.constant 0 : i32
    %2 = arith.cmpi ne, %1, %c0_i32_0 : i32
    scf.if %2 {
      %cst_10 = arith.constant 0.000000e+00 : f32
      %12 = vector.broadcast %cst_10 : f32 to vector<32x128xf32>
      %c0_11 = arith.constant 0 : index
      %c0_12 = arith.constant 0 : index
      %13 = vector.load %arg9[%c0_11, %c0_12] : memref<32x128xf32, #tpu.memory_space<vmem>>, vector<32x128xf32>
      tpu.vector_store %arg9[%c0_11, %c0_12], %12 {strides = array<i32>} : memref<32x128xf32, #tpu.memory_space<vmem>>, vector<32x128xf32>,
    } else {
    }
    %c0 = arith.constant 0 : index
    %c0_1 = arith.constant 0 : index
    %3 = vector.load %arg9[%c0, %c0_1] : memref<32x128xf32, #tpu.memory_space<vmem>>, vector<32x128xf32>
    %c0_2 = arith.constant 0 : index
    %c0_3 = arith.constant 0 : index
    %4 = vector.load %arg4[%c0_2, %c0_3] : memref<32x128xbf16, #tpu.memory_space<vmem>>, vector<32x128xbf16>
    %c0_4 = arith.constant 0 : index
    %c0_5 = arith.constant 0 : index
    %5 = vector.load %arg2[%c0_4, %c0_5] : memref<128x128xbf16, #tpu.memory_space<vmem>>, vector<128x128xbf16>
    %cst = arith.constant dense<0.000000e+00> : vector<32x128xf32>
    %6 = tpu.matmul %4, %5, %cst {dimension_numbers = #tpu.dot_dimension_numbers<[1], [0], [0], [1], [0, 0, 1, 1], [], []>} : vector<32x128xbf16>, vector<128x128xbf16>, vector<32x128xf32> -> vector<32x128xf32>
    %7 = arith.addf %3, %6 : vector<32x128xf32>
    %c0_6 = arith.constant 0 : index
    %c0_7 = arith.constant 0 : index
    %8 = vector.load %arg9[%c0_6, %c0_7] : memref<32x128xf32, #tpu.memory_space<vmem>>, vector<32x128xf32>
    tpu.vector_store %arg9[%c0_6, %c0_7], %7 {strides = array<i32>} : memref<32x128xf32, #tpu.memory_space<vmem>>, vector<32x128xf32>,
    %c0_i32_8 = arith.constant 0 : i32
    %9 = arith.cmpi eq, %arg1, %c0_i32_8 : i32
    %10 = arith.extui %9 : i1 to i32
    %c0_i32_9 = arith.constant 0 : i32
    %11 = arith.cmpi ne, %10, %c0_i32_9 : i32
    scf.if %11 {
      %c0_10 = arith.constant 0 : index
      %c0_11 = arith.constant 0 : index
      %12 = vector.load %arg9[%c0_10, %c0_11] : memref<32x128xf32, #tpu.memory_space<vmem>>, vector<32x128xf32>
      %13 = vector.extract_strided_slice %12 {offsets = [0, 32], sizes = [32, 1], strides = [1, 1]} : vector<32x128xf32> to vector<32x1xf32>
      %cst_12 = arith.constant 1.000000e+00 : f32
      %14 = vector.broadcast %cst_12 : f32 to vector<32x1xf32>
      %15 = arith.maximumf %13, %14 : vector<32x1xf32>
      %16 = tpu.reciprocal %15 {approx = true} : vector<32x1xf32> -> vector<32x1xf32>
      %17 = vector.broadcast %16 : vector<32x1xf32> to vector<32x128xf32>
      %18 = arith.mulf %12, %17 : vector<32x128xf32>
      %c0_13 = arith.constant 0 : index
      %c0_14 = arith.constant 0 : index
      %19 = vector.load %arg3[%c0_13, %c0_14] : memref<32x128xbf16, #tpu.memory_space<vmem>>, vector<32x128xbf16>
      %c0_15 = arith.constant 0 : index
      %c0_16 = arith.constant 0 : index
      %20 = vector.load %arg5[%c0_15, %c0_16] : memref<128x128xbf16, #tpu.memory_space<vmem>>, vector<128x128xbf16>
      %cst_17 = arith.constant dense<0.000000e+00> : vector<32x128xf32>
      %21 = tpu.matmul %19, %20, %cst_17 {dimension_numbers = #tpu.dot_dimension_numbers<[1], [0], [0], [1], [0, 0, 1, 1], [], []>} : vector<32x128xbf16>, vector<128x128xbf16>, vector<32x128xf32> -> vector<32x128xf32>
      %22 = arith.truncf %18 : vector<32x128xf32> to vector<32x128xbf16>
      %c0_18 = arith.constant 0 : index
      %c0_19 = arith.constant 0 : index
      %23 = vector.load %arg6[%c0_18, %c0_19] : memref<128x128xbf16, #tpu.memory_space<vmem>>, vector<128x128xbf16>
      %cst_20 = arith.constant dense<0.000000e+00> : vector<32x128xf32>
      %24 = tpu.matmul %22, %23, %cst_20 {dimension_numbers = #tpu.dot_dimension_numbers<[1], [0], [0], [1], [0, 0, 1, 1], [], []>} : vector<32x128xbf16>, vector<128x128xbf16>, vector<32x128xf32> -> vector<32x128xf32>
      %25 = arith.addf %21, %24 : vector<32x128xf32>
      %c0_21 = arith.constant 0 : index
      %c0_22 = arith.constant 0 : index
      %26 = vector.load %arg7[%c0_21, %c0_22] : memref<1x128xf32, #tpu.memory_space<vmem>>, vector<1x128xf32>
      %27 = vector.broadcast %26 : vector<1x128xf32> to vector<32x128xf32>
      %28 = arith.addf %25, %27 : vector<32x128xf32>
      %cst_23 = arith.constant 0.000000e+00 : f32
      %29 = vector.broadcast %cst_23 : f32 to vector<32x128xf32>
      %30 = arith.maximumf %28, %29 : vector<32x128xf32>
      %c0_24 = arith.constant 0 : index
      %c0_25 = arith.constant 0 : index
      %31 = vector.load %arg8[%c0_24, %c0_25] : memref<32x128xf32, #tpu.memory_space<vmem>>, vector<32x128xf32>
      tpu.vector_store %arg8[%c0_24, %c0_25], %30 {strides = array<i32>} : memref<32x128xf32, #tpu.memory_space<vmem>>, vector<32x128xf32>,
    } else {
    }
    return
  }
  func.func @transform_0(%arg0: i32, %arg1: i32) -> (i32, i32) {
    %c0_i32 = arith.constant 0 : i32
    %c0_i32_0 = arith.constant 0 : i32
    return %arg1, %c0_i32 : i32, i32
  }
  func.func @transform_1(%arg0: i32, %arg1: i32) -> (i32, i32) {
    %c0_i32 = arith.constant 0 : i32
    %c0_i32_0 = arith.constant 0 : i32
    return %arg0, %c0_i32 : i32, i32
  }
  func.func @transform_2(%arg0: i32, %arg1: i32) -> (i32, i32) {
    %c0_i32 = arith.constant 0 : i32
    return %arg0, %arg1 : i32, i32
  }
  func.func @transform_3(%arg0: i32, %arg1: i32) -> (i32, i32) {
    %c0_i32 = arith.constant 0 : i32
    %c0_i32_0 = arith.constant 0 : i32
    %c0_i32_1 = arith.constant 0 : i32
    return %c0_i32, %c0_i32_0 : i32, i32
  }
  func.func @transform_4(%arg0: i32, %arg1: i32) -> (i32, i32) {
    %c0_i32 = arith.constant 0 : i32
    %c0_i32_0 = arith.constant 0 : i32
    %c0_i32_1 = arith.constant 0 : i32
    return %c0_i32, %c0_i32_0 : i32, i32
  }
  func.func @transform_5(%arg0: i32, %arg1: i32) -> (i32, i32) {
    %c0_i32 = arith.constant 0 : i32
    %c0_i32_0 = arith.constant 0 : i32
    %c0_i32_1 = arith.constant 0 : i32
    return %c0_i32, %c0_i32_0 : i32, i32
  }
  func.func @transform_6(%arg0: i32, %arg1: i32) -> (i32, i32) {
    %c0_i32 = arith.constant 0 : i32
    %c0_i32_0 = arith.constant 0 : i32
    return %arg0, %c0_i32 : i32, i32
  }
}

module attributes {stable_mosaic.version = 11 : i64} {
  func.func @_sage_kernel(%arg0: i32, %arg1: i32, %arg2: memref<128x128xbf16, #tpu.memory_space<vmem>>, %arg3: memref<16x128xbf16, #tpu.memory_space<vmem>>, %arg4: memref<16x128xbf16, #tpu.memory_space<vmem>>, %arg5: memref<128x128xbf16, #tpu.memory_space<vmem>>, %arg6: memref<128x128xbf16, #tpu.memory_space<vmem>>, %arg7: memref<1x128xf32, #tpu.memory_space<vmem>>, %arg8: memref<16x128xf32, #tpu.memory_space<vmem>>, %arg9: memref<16x128xf32, #tpu.memory_space<vmem>>) attributes {dimension_semantics = [#tpu.dimension_semantics<parallel>, #tpu.dimension_semantics<arbitrary>], iteration_bounds = array<i64: 1, 1>, scalar_prefetch = 0 : i64, scratch_operands = 1 : i64, tpu.core_type = #tpu.core_type<tc>, window_params = [{transform_indices = @transform_0, window_bounds = array<i64: 128, 128>}, {transform_indices = @transform_1, window_bounds = array<i64: 16, 128>}, {transform_indices = @transform_2, window_bounds = array<i64: 16, 128>}, {pipeline_mode = #tpu.pipeline_mode<synchronous>, transform_indices = @transform_3, window_bounds = array<i64: 128, 128>}, {pipeline_mode = #tpu.pipeline_mode<synchronous>, transform_indices = @transform_4, window_bounds = array<i64: 128, 128>}, {pipeline_mode = #tpu.pipeline_mode<synchronous>, transform_indices = @transform_5, window_bounds = array<i64: 1, 128>}, {transform_indices = @transform_6, window_bounds = array<i64: 16, 128>}]} {
    %c0_i32 = arith.constant 0 : i32
    %0 = arith.cmpi eq, %arg1, %c0_i32 : i32
    %1 = arith.extui %0 : i1 to i32
    %c0_i32_0 = arith.constant 0 : i32
    %2 = arith.cmpi ne, %1, %c0_i32_0 : i32
    scf.if %2 {
      %cst_10 = arith.constant 0.000000e+00 : f32
      %12 = vector.broadcast %cst_10 : f32 to vector<16x128xf32>
      %c0_11 = arith.constant 0 : index
      %c0_12 = arith.constant 0 : index
      %13 = vector.load %arg9[%c0_11, %c0_12] : memref<16x128xf32, #tpu.memory_space<vmem>>, vector<16x128xf32>
      tpu.vector_store %arg9[%c0_11, %c0_12], %12 {strides = array<i32>} : memref<16x128xf32, #tpu.memory_space<vmem>>, vector<16x128xf32>,
    } else {
    }
    %c0 = arith.constant 0 : index
    %c0_1 = arith.constant 0 : index
    %3 = vector.load %arg9[%c0, %c0_1] : memref<16x128xf32, #tpu.memory_space<vmem>>, vector<16x128xf32>
    %c0_2 = arith.constant 0 : index
    %c0_3 = arith.constant 0 : index
    %4 = vector.load %arg4[%c0_2, %c0_3] : memref<16x128xbf16, #tpu.memory_space<vmem>>, vector<16x128xbf16>
    %c0_4 = arith.constant 0 : index
    %c0_5 = arith.constant 0 : index
    %5 = vector.load %arg2[%c0_4, %c0_5] : memref<128x128xbf16, #tpu.memory_space<vmem>>, vector<128x128xbf16>
    %cst = arith.constant dense<0.000000e+00> : vector<16x128xf32>
    %6 = tpu.matmul %4, %5, %cst {dimension_numbers = #tpu.dot_dimension_numbers<[1], [0], [0], [1], [0, 0, 1, 1], [], []>} : vector<16x128xbf16>, vector<128x128xbf16>, vector<16x128xf32> -> vector<16x128xf32>
    %7 = arith.addf %3, %6 : vector<16x128xf32>
    %c0_6 = arith.constant 0 : index
    %c0_7 = arith.constant 0 : index
    %8 = vector.load %arg9[%c0_6, %c0_7] : memref<16x128xf32, #tpu.memory_space<vmem>>, vector<16x128xf32>
    tpu.vector_store %arg9[%c0_6, %c0_7], %7 {strides = array<i32>} : memref<16x128xf32, #tpu.memory_space<vmem>>, vector<16x128xf32>,
    %c0_i32_8 = arith.constant 0 : i32
    %9 = arith.cmpi eq, %arg1, %c0_i32_8 : i32
    %10 = arith.extui %9 : i1 to i32
    %c0_i32_9 = arith.constant 0 : i32
    %11 = arith.cmpi ne, %10, %c0_i32_9 : i32
    scf.if %11 {
      %c0_10 = arith.constant 0 : index
      %c0_11 = arith.constant 0 : index
      %12 = vector.load %arg9[%c0_10, %c0_11] : memref<16x128xf32, #tpu.memory_space<vmem>>, vector<16x128xf32>
      %13 = vector.extract_strided_slice %12 {offsets = [0, 16], sizes = [16, 1], strides = [1, 1]} : vector<16x128xf32> to vector<16x1xf32>
      %cst_12 = arith.constant 1.000000e+00 : f32
      %14 = vector.broadcast %cst_12 : f32 to vector<16x1xf32>
      %15 = arith.maximumf %13, %14 : vector<16x1xf32>
      %16 = tpu.reciprocal %15 {approx = true} : vector<16x1xf32> -> vector<16x1xf32>
      %17 = vector.broadcast %16 : vector<16x1xf32> to vector<16x128xf32>
      %18 = arith.mulf %12, %17 : vector<16x128xf32>
      %c0_13 = arith.constant 0 : index
      %c0_14 = arith.constant 0 : index
      %19 = vector.load %arg3[%c0_13, %c0_14] : memref<16x128xbf16, #tpu.memory_space<vmem>>, vector<16x128xbf16>
      %c0_15 = arith.constant 0 : index
      %c0_16 = arith.constant 0 : index
      %20 = vector.load %arg5[%c0_15, %c0_16] : memref<128x128xbf16, #tpu.memory_space<vmem>>, vector<128x128xbf16>
      %cst_17 = arith.constant dense<0.000000e+00> : vector<16x128xf32>
      %21 = tpu.matmul %19, %20, %cst_17 {dimension_numbers = #tpu.dot_dimension_numbers<[1], [0], [0], [1], [0, 0, 1, 1], [], []>} : vector<16x128xbf16>, vector<128x128xbf16>, vector<16x128xf32> -> vector<16x128xf32>
      %22 = arith.truncf %18 : vector<16x128xf32> to vector<16x128xbf16>
      %c0_18 = arith.constant 0 : index
      %c0_19 = arith.constant 0 : index
      %23 = vector.load %arg6[%c0_18, %c0_19] : memref<128x128xbf16, #tpu.memory_space<vmem>>, vector<128x128xbf16>
      %cst_20 = arith.constant dense<0.000000e+00> : vector<16x128xf32>
      %24 = tpu.matmul %22, %23, %cst_20 {dimension_numbers = #tpu.dot_dimension_numbers<[1], [0], [0], [1], [0, 0, 1, 1], [], []>} : vector<16x128xbf16>, vector<128x128xbf16>, vector<16x128xf32> -> vector<16x128xf32>
      %25 = arith.addf %21, %24 : vector<16x128xf32>
      %c0_21 = arith.constant 0 : index
      %c0_22 = arith.constant 0 : index
      %26 = vector.load %arg7[%c0_21, %c0_22] : memref<1x128xf32, #tpu.memory_space<vmem>>, vector<1x128xf32>
      %27 = vector.broadcast %26 : vector<1x128xf32> to vector<16x128xf32>
      %28 = arith.addf %25, %27 : vector<16x128xf32>
      %cst_23 = arith.constant 0.000000e+00 : f32
      %29 = vector.broadcast %cst_23 : f32 to vector<16x128xf32>
      %30 = arith.maximumf %28, %29 : vector<16x128xf32>
      %c0_24 = arith.constant 0 : index
      %c0_25 = arith.constant 0 : index
      %31 = vector.load %arg8[%c0_24, %c0_25] : memref<16x128xf32, #tpu.memory_space<vmem>>, vector<16x128xf32>
      tpu.vector_store %arg8[%c0_24, %c0_25], %30 {strides = array<i32>} : memref<16x128xf32, #tpu.memory_space<vmem>>, vector<16x128xf32>,
    } else {
    }
    return
  }
  func.func @transform_0(%arg0: i32, %arg1: i32) -> (i32, i32) {
    %c0_i32 = arith.constant 0 : i32
    %c0_i32_0 = arith.constant 0 : i32
    return %arg1, %c0_i32 : i32, i32
  }
  func.func @transform_1(%arg0: i32, %arg1: i32) -> (i32, i32) {
    %c0_i32 = arith.constant 0 : i32
    %c0_i32_0 = arith.constant 0 : i32
    return %arg0, %c0_i32 : i32, i32
  }
  func.func @transform_2(%arg0: i32, %arg1: i32) -> (i32, i32) {
    %c0_i32 = arith.constant 0 : i32
    return %arg0, %arg1 : i32, i32
  }
  func.func @transform_3(%arg0: i32, %arg1: i32) -> (i32, i32) {
    %c0_i32 = arith.constant 0 : i32
    %c0_i32_0 = arith.constant 0 : i32
    %c0_i32_1 = arith.constant 0 : i32
    return %c0_i32, %c0_i32_0 : i32, i32
  }
  func.func @transform_4(%arg0: i32, %arg1: i32) -> (i32, i32) {
    %c0_i32 = arith.constant 0 : i32
    %c0_i32_0 = arith.constant 0 : i32
    %c0_i32_1 = arith.constant 0 : i32
    return %c0_i32, %c0_i32_0 : i32, i32
  }
  func.func @transform_5(%arg0: i32, %arg1: i32) -> (i32, i32) {
    %c0_i32 = arith.constant 0 : i32
    %c0_i32_0 = arith.constant 0 : i32
    %c0_i32_1 = arith.constant 0 : i32
    return %c0_i32, %c0_i32_0 : i32, i32
  }
  func.func @transform_6(%arg0: i32, %arg1: i32) -> (i32, i32) {
    %c0_i32 = arith.constant 0 : i32
    %c0_i32_0 = arith.constant 0 : i32
    return %arg0, %c0_i32 : i32, i32
  }
}

module attributes {stable_mosaic.version = 11 : i64} {
  func.func @_sage_kernel(%arg0: i32, %arg1: i32, %arg2: memref<128x128xbf16, #tpu.memory_space<vmem>>, %arg3: memref<8x128xbf16, #tpu.memory_space<vmem>>, %arg4: memref<8x128xbf16, #tpu.memory_space<vmem>>, %arg5: memref<128x128xbf16, #tpu.memory_space<vmem>>, %arg6: memref<128x128xbf16, #tpu.memory_space<vmem>>, %arg7: memref<1x128xf32, #tpu.memory_space<vmem>>, %arg8: memref<8x128xf32, #tpu.memory_space<vmem>>, %arg9: memref<8x128xf32, #tpu.memory_space<vmem>>) attributes {dimension_semantics = [#tpu.dimension_semantics<parallel>, #tpu.dimension_semantics<arbitrary>], iteration_bounds = array<i64: 1, 1>, scalar_prefetch = 0 : i64, scratch_operands = 1 : i64, tpu.core_type = #tpu.core_type<tc>, window_params = [{transform_indices = @transform_0, window_bounds = array<i64: 128, 128>}, {transform_indices = @transform_1, window_bounds = array<i64: 8, 128>}, {transform_indices = @transform_2, window_bounds = array<i64: 8, 128>}, {pipeline_mode = #tpu.pipeline_mode<synchronous>, transform_indices = @transform_3, window_bounds = array<i64: 128, 128>}, {pipeline_mode = #tpu.pipeline_mode<synchronous>, transform_indices = @transform_4, window_bounds = array<i64: 128, 128>}, {pipeline_mode = #tpu.pipeline_mode<synchronous>, transform_indices = @transform_5, window_bounds = array<i64: 1, 128>}, {transform_indices = @transform_6, window_bounds = array<i64: 8, 128>}]} {
    %c0_i32 = arith.constant 0 : i32
    %0 = arith.cmpi eq, %arg1, %c0_i32 : i32
    %1 = arith.extui %0 : i1 to i32
    %c0_i32_0 = arith.constant 0 : i32
    %2 = arith.cmpi ne, %1, %c0_i32_0 : i32
    scf.if %2 {
      %cst_10 = arith.constant 0.000000e+00 : f32
      %12 = vector.broadcast %cst_10 : f32 to vector<8x128xf32>
      %c0_11 = arith.constant 0 : index
      %c0_12 = arith.constant 0 : index
      %13 = vector.load %arg9[%c0_11, %c0_12] : memref<8x128xf32, #tpu.memory_space<vmem>>, vector<8x128xf32>
      tpu.vector_store %arg9[%c0_11, %c0_12], %12 {strides = array<i32>} : memref<8x128xf32, #tpu.memory_space<vmem>>, vector<8x128xf32>,
    } else {
    }
    %c0 = arith.constant 0 : index
    %c0_1 = arith.constant 0 : index
    %3 = vector.load %arg9[%c0, %c0_1] : memref<8x128xf32, #tpu.memory_space<vmem>>, vector<8x128xf32>
    %c0_2 = arith.constant 0 : index
    %c0_3 = arith.constant 0 : index
    %4 = vector.load %arg4[%c0_2, %c0_3] : memref<8x128xbf16, #tpu.memory_space<vmem>>, vector<8x128xbf16>
    %c0_4 = arith.constant 0 : index
    %c0_5 = arith.constant 0 : index
    %5 = vector.load %arg2[%c0_4, %c0_5] : memref<128x128xbf16, #tpu.memory_space<vmem>>, vector<128x128xbf16>
    %cst = arith.constant dense<0.000000e+00> : vector<8x128xf32>
    %6 = tpu.matmul %4, %5, %cst {dimension_numbers = #tpu.dot_dimension_numbers<[1], [0], [0], [1], [0, 0, 1, 1], [], []>} : vector<8x128xbf16>, vector<128x128xbf16>, vector<8x128xf32> -> vector<8x128xf32>
    %7 = arith.addf %3, %6 : vector<8x128xf32>
    %c0_6 = arith.constant 0 : index
    %c0_7 = arith.constant 0 : index
    %8 = vector.load %arg9[%c0_6, %c0_7] : memref<8x128xf32, #tpu.memory_space<vmem>>, vector<8x128xf32>
    tpu.vector_store %arg9[%c0_6, %c0_7], %7 {strides = array<i32>} : memref<8x128xf32, #tpu.memory_space<vmem>>, vector<8x128xf32>,
    %c0_i32_8 = arith.constant 0 : i32
    %9 = arith.cmpi eq, %arg1, %c0_i32_8 : i32
    %10 = arith.extui %9 : i1 to i32
    %c0_i32_9 = arith.constant 0 : i32
    %11 = arith.cmpi ne, %10, %c0_i32_9 : i32
    scf.if %11 {
      %c0_10 = arith.constant 0 : index
      %c0_11 = arith.constant 0 : index
      %12 = vector.load %arg9[%c0_10, %c0_11] : memref<8x128xf32, #tpu.memory_space<vmem>>, vector<8x128xf32>
      %13 = vector.extract_strided_slice %12 {offsets = [0, 16], sizes = [8, 1], strides = [1, 1]} : vector<8x128xf32> to vector<8x1xf32>
      %cst_12 = arith.constant 1.000000e+00 : f32
      %14 = vector.broadcast %cst_12 : f32 to vector<8x1xf32>
      %15 = arith.maximumf %13, %14 : vector<8x1xf32>
      %16 = tpu.reciprocal %15 {approx = true} : vector<8x1xf32> -> vector<8x1xf32>
      %17 = vector.broadcast %16 : vector<8x1xf32> to vector<8x128xf32>
      %18 = arith.mulf %12, %17 : vector<8x128xf32>
      %c0_13 = arith.constant 0 : index
      %c0_14 = arith.constant 0 : index
      %19 = vector.load %arg3[%c0_13, %c0_14] : memref<8x128xbf16, #tpu.memory_space<vmem>>, vector<8x128xbf16>
      %c0_15 = arith.constant 0 : index
      %c0_16 = arith.constant 0 : index
      %20 = vector.load %arg5[%c0_15, %c0_16] : memref<128x128xbf16, #tpu.memory_space<vmem>>, vector<128x128xbf16>
      %cst_17 = arith.constant dense<0.000000e+00> : vector<8x128xf32>
      %21 = tpu.matmul %19, %20, %cst_17 {dimension_numbers = #tpu.dot_dimension_numbers<[1], [0], [0], [1], [0, 0, 1, 1], [], []>} : vector<8x128xbf16>, vector<128x128xbf16>, vector<8x128xf32> -> vector<8x128xf32>
      %22 = arith.truncf %18 : vector<8x128xf32> to vector<8x128xbf16>
      %c0_18 = arith.constant 0 : index
      %c0_19 = arith.constant 0 : index
      %23 = vector.load %arg6[%c0_18, %c0_19] : memref<128x128xbf16, #tpu.memory_space<vmem>>, vector<128x128xbf16>
      %cst_20 = arith.constant dense<0.000000e+00> : vector<8x128xf32>
      %24 = tpu.matmul %22, %23, %cst_20 {dimension_numbers = #tpu.dot_dimension_numbers<[1], [0], [0], [1], [0, 0, 1, 1], [], []>} : vector<8x128xbf16>, vector<128x128xbf16>, vector<8x128xf32> -> vector<8x128xf32>
      %25 = arith.addf %21, %24 : vector<8x128xf32>
      %c0_21 = arith.constant 0 : index
      %c0_22 = arith.constant 0 : index
      %26 = vector.load %arg7[%c0_21, %c0_22] : memref<1x128xf32, #tpu.memory_space<vmem>>, vector<1x128xf32>
      %27 = vector.broadcast %26 : vector<1x128xf32> to vector<8x128xf32>
      %28 = arith.addf %25, %27 : vector<8x128xf32>
      %c0_23 = arith.constant 0 : index
      %c0_24 = arith.constant 0 : index
      %29 = vector.load %arg8[%c0_23, %c0_24] : memref<8x128xf32, #tpu.memory_space<vmem>>, vector<8x128xf32>
      tpu.vector_store %arg8[%c0_23, %c0_24], %28 {strides = array<i32>} : memref<8x128xf32, #tpu.memory_space<vmem>>, vector<8x128xf32>,
    } else {
    }
    return
  }
  func.func @transform_0(%arg0: i32, %arg1: i32) -> (i32, i32) {
    %c0_i32 = arith.constant 0 : i32
    %c0_i32_0 = arith.constant 0 : i32
    return %arg1, %c0_i32 : i32, i32
  }
  func.func @transform_1(%arg0: i32, %arg1: i32) -> (i32, i32) {
    %c0_i32 = arith.constant 0 : i32
    %c0_i32_0 = arith.constant 0 : i32
    return %arg0, %c0_i32 : i32, i32
  }
  func.func @transform_2(%arg0: i32, %arg1: i32) -> (i32, i32) {
    %c0_i32 = arith.constant 0 : i32
    return %arg0, %arg1 : i32, i32
  }
  func.func @transform_3(%arg0: i32, %arg1: i32) -> (i32, i32) {
    %c0_i32 = arith.constant 0 : i32
    %c0_i32_0 = arith.constant 0 : i32
    %c0_i32_1 = arith.constant 0 : i32
    return %c0_i32, %c0_i32_0 : i32, i32
  }
  func.func @transform_4(%arg0: i32, %arg1: i32) -> (i32, i32) {
    %c0_i32 = arith.constant 0 : i32
    %c0_i32_0 = arith.constant 0 : i32
    %c0_i32_1 = arith.constant 0 : i32
    return %c0_i32, %c0_i32_0 : i32, i32
  }
  func.func @transform_5(%arg0: i32, %arg1: i32) -> (i32, i32) {
    %c0_i32 = arith.constant 0 : i32
    %c0_i32_0 = arith.constant 0 : i32
    %c0_i32_1 = arith.constant 0 : i32
    return %c0_i32, %c0_i32_0 : i32, i32
  }
  func.func @transform_6(%arg0: i32, %arg1: i32) -> (i32, i32) {
    %c0_i32 = arith.constant 0 : i32
    %c0_i32_0 = arith.constant 0 : i32
    return %arg0, %c0_i32 : i32, i32
  }
}

</mosaic_0001>

<bundles_post_ra>
// kernel: dist_sage_forward.3
= control target key start
LH: loop header
LB: loop body
LE: loop exit
PB: predicated region body
PF: predicated region fallthrough
CT: control target
= control target key end

     0   :  { %v641_v10 = vmov 32   ;;  %s776_s0 = inlined_call_operand.vmem [shape: bf16[128,128], index: 0, kind: input, shape index: {}, may-alias: {0,1}]   ;;  %s777_s2 = inlined_call_operand.vmem [shape: bf16[32,128], index: 2, kind: input, shape index: {}]   ;;  %s778_s4 = inlined_call_operand.vmem [shape: bf16[128,128], index: 4, kind: input, shape index: {}]   ;;  %s779_s3 = inlined_call_operand.vmem [shape: bf16[128,128], index: 3, kind: input, shape index: {}]   ;;  %s780_s1 = inlined_call_operand.vmem [shape: bf16[128,128], index: 1, kind: input, shape index: {}, may-alias: {0,1}]   ;;  %s781_s5 = inlined_call_operand.vmem [shape: f32[1,128], index: 5, kind: input, shape index: {}]   ;;  %s782_s6 = inlined_call_operand.vmem [shape: f32[32,128], index: 6, kind: output, shape index: {}]  }
   0x1   :  { %v605_v0 = vld [vmem:[%s776_s0] sm:$0xff]   ;;  %v606_v1 = vld [vmem:[%s776_s0 + $0x8] sm:$0xff]   ;;  %v607_v2 = vld [vmem:[%s776_s0 + $0x10] sm:$0xff]   ;;  %604 = vset.pattern.permute.xlu1 %v641_v10  ;;  %603 = vset.pattern.permute.xlu0 %v641_v10 }
   0x2   :  { %538 = vmatprep.subr.bf16.mxu0 %v605_v0  ;;  %v608_v3 = vld [vmem:[%s776_s0 + $0x18] sm:$0xff]   ;;  %v613_v4 = vld [vmem:[%s777_s2] sm:$0xff]   ;;  %v610_v6 = vld [vmem:[%s776_s0 + $0x28] sm:$0xff]  }
   0x3   :  { %539 = vmatpush3.bf16.msra.mxu0 %v605_v0  ;;  %554 = vmatprep.mubr.bf16.mxu0 %v613_v4  ;;  %v609_v5 = vld [vmem:[%s776_s0 + $0x20] sm:$0xff]   ;;  %v611_v7 = vld [vmem:[%s776_s0 + $0x30] sm:$0xff]   ;;  %v612_v8 = vld [vmem:[%s776_s0 + $0x38] sm:$0xff]  }
   0x4   :  { %540 = vmatprep.subr.bf16.mxu0 %v606_v1  ;;  %v614_v9 = vld [vmem:[%s777_s2 + $0x8] sm:$0xff]   ;;  %v615_v11 = vld [vmem:[%s778_s4] sm:$0xff]   ;;  %v617_v13 = vld [vmem:[%s778_s4 + $0x10] sm:$0xff]  }
   0x5   :  { %v616_v12 = vld [vmem:[%s778_s4 + $0x8] sm:$0xff]   ;;  %558 = vmatprep.subr.bf16.mxu1 %v615_v11  ;;  %v618_v14 = vld [vmem:[%s778_s4 + $0x18] sm:$0xff]   ;;  %v619_v15 = vld [vmem:[%s778_s4 + $0x20] sm:$0xff]  }
   0x6   :  { %559 = vmatpush3.bf16.msra.mxu1 %v615_v11  ;;  %v620_v16 = vld [vmem:[%s778_s4 + $0x28] sm:$0xff]   ;;  %v621_v26 = vld [vmem:[%s778_s4 + $0x30] sm:$0xff]   ;;  %v622_v29 = vld [vmem:[%s778_s4 + $0x38] sm:$0xff]  }
   0x7   :  { %541 = vmatpush3.bf16.msra.mxu0 %v606_v1  ;;  %560 = vmatprep.subr.bf16.mxu1 %v616_v12  ;;  %v623_v31 = vld [vmem:[%s779_s3] sm:$0xff]   ;;  %v624_v43 = vld [vmem:[%s779_s3 + $0x8] sm:$0xff]   ;;  %v625_v44 = vld [vmem:[%s779_s3 + $0x10] sm:$0xff]  }
   0x8   :  { %542 = vmatprep.subr.bf16.mxu0 %v607_v2  ;;  %v631_v42 = vld [vmem:[%s780_s1] sm:$0xff]   ;;  %v626_v45 = vld [vmem:[%s779_s3 + $0x18] sm:$0xff]   ;;  %v628_v47 = vld [vmem:[%s779_s3 + $0x28] sm:$0xff]  }
   0x9   :  { %v627_v46 = vld [vmem:[%s779_s3 + $0x20] sm:$0xff]   ;;  %v629_v48 = vld [vmem:[%s779_s3 + $0x30] sm:$0xff]   ;;  %v630_v49 = vld [vmem:[%s779_s3 + $0x38] sm:$0xff]  }
   0xa   :  { %561 = vmatpush3.bf16.msra.mxu1 %v616_v12  ;;  %v632_v50 = vld [vmem:[%s780_s1 + $0x8] sm:$0xff]   ;;  %v507_v51 = vld [vmem:[%s781_s5] ss:$0 sm:$0xff] }
   0xb   :  { %543 = vmatpush3.bf16.msra.mxu0 %v607_v2  ;;  %562 = vmatprep.subr.bf16.mxu1 %v617_v13 }
   0xc   :  { %544 = vmatprep.subr.bf16.mxu0 %v608_v3 }
   0xe   :  { %563 = vmatpush3.bf16.msra.mxu1 %v617_v13 }
   0xf   :  { %545 = vmatpush3.bf16.msra.mxu0 %v608_v3  ;;  %564 = vmatprep.subr.bf16.mxu1 %v618_v14 }
  0x10   :  { %546 = vmatprep.subr.bf16.mxu0 %v609_v5 }
  0x12   :  { %565 = vmatpush3.bf16.msra.mxu1 %v618_v14 }
  0x13   :  { %547 = vmatpush3.bf16.msra.mxu0 %v609_v5  ;;  %566 = vmatprep.subr.bf16.mxu1 %v619_v15 }
  0x14   :  { %548 = vmatprep.subr.bf16.mxu0 %v610_v6 }
  0x16   :  { %567 = vmatpush3.bf16.msra.mxu1 %v619_v15 }
  0x17   :  { %549 = vmatpush3.bf16.msra.mxu0 %v610_v6  ;;  %568 = vmatprep.subr.bf16.mxu1 %v620_v16 }
  0x18   :  { %550 = vmatprep.subr.bf16.mxu0 %v611_v7 }
  0x1a   :  { %569 = vmatpush3.bf16.msra.mxu1 %v620_v16 }
  0x1b   :  { %551 = vmatpush3.bf16.msra.mxu0 %v611_v7  ;;  %570 = vmatprep.subr.bf16.mxu1 %v621_v26 }
  0x1c   :  { %552 = vmatprep.subr.bf16.mxu0 %v612_v8 }
  0x1e   :  { %571 = vmatpush3.bf16.msra.mxu1 %v621_v26 }
  0x1f   :  { %553 = vmatpush3.bf16.msra.mxu0 %v612_v8  ;;  %572 = vmatprep.subr.bf16.mxu1 %v622_v29 }
  0x22   :  { %555 = vmatmul.mubr.bf16.vlgmr.msra.gmra.mrb[0].mxu0 %v614_v9  ;;  %573 = vmatpush3.bf16.msra.mxu1 %v622_v29 }
  0x23   :  { %578 = vmatprep.subr.bf16.mxu1 %v623_v31 }
  0xf5   :  { %v556_v17 = vpop.f32.mrb[0].mxu0 }
  0xf6   :  { %v182_v18 = vmax.f32 %v556_v17, 1.0  ;;  %v150_v19 = vpop.f32.mrb[1].mxu0 }
  0xf7   :  { %v180_v20 = vmax.f32 %v150_v19, 1.0  ;;  %v557_v21 = vpop.f32.mrb[2].mxu0 }
  0xf8   :  { %633 = vrcp.f32 %v182_v18  ;;  %v183_v22 = vmax.f32 %v557_v21, 1.0  ;;  %v153_v23 = vpop.f32.mrb[3].mxu0 }
  0xf9   :  { %635 = vrcp.f32 %v180_v20  ;;  %v181_v24 = vmax.f32 %v153_v23, 1.0 }
  0xfa   :  { %637 = vrcp.f32 %v183_v22 }
  0xfb   :  { %639 = vrcp.f32 %v181_v24 }
 0x102   :  { %v634_v25 = vpop.eup %633 }
 0x103   :  { %v636_v27 = vpop.eup %635  ;;  %200 = vperm.xlu1 %604, %v634_v25  }
 0x104   :  { %190 = vperm.xlu0 %603, %v636_v27   ;;  %v638_v28 = vpop.eup %637 }
 0x105   :  { %v640_v30 = vpop.eup %639 }
 0x107   :  { %205 = vperm.xlu1 %604, %v638_v28  }
 0x108   :  { %195 = vperm.xlu0 %603, %v640_v30  }
 0x182   :  { %v201_v32 = vpop.permute.xlu1 %200 }
 0x183   :  { %v191_v33 = vpop.permute.xlu0 %190  ;;  %v210_v35 = vmul.f32 %v556_v17, %v201_v32 }
 0x184   :  { %v208_v38 = vmul.f32 %v191_v33, %v150_v19 }
 0x186   :  { %v206_v34 = vpop.permute.xlu1 %205 }
 0x187   :  { %v211_v36 = vmul.f32 %v557_v21, %v206_v34  ;;  %v196_v37 = vpop.permute.xlu0 %195 }
 0x188   :  { %v209_v39 = vmul.f32 %v196_v37, %v153_v23 }
 0x189   :  { %v233_v40 = vpack.c.bf16 %v211_v36, %v210_v35 }
 0x18a   :  { %v232_v41 = vpack.c.bf16 %v209_v39, %v208_v38 }
 0x18c   :  { %574 = vmatprep.mubr.bf16.mxu1 %v232_v41 }
 0x18d   :  { %575 = vmatmul.mubr.bf16.vlgmr.msra.gmra.mrb[0].mxu1 %v233_v40 }
 0x18e   :  { %579 = vmatpush3.bf16.msra.mxu1 %v623_v31  ;;  %594 = vmatprep.mubr.bf16.mxu1 %v631_v42 }
 0x18f   :  { %580 = vmatprep.subr.bf16.mxu1 %v624_v43 }
 0x192   :  { %581 = vmatpush3.bf16.msra.mxu1 %v624_v43 }
 0x193   :  { %582 = vmatprep.subr.bf16.mxu1 %v625_v44 }
 0x196   :  { %583 = vmatpush3.bf16.msra.mxu1 %v625_v44 }
 0x197   :  { %584 = vmatprep.subr.bf16.mxu1 %v626_v45 }
 0x19a   :  { %585 = vmatpush3.bf16.msra.mxu1 %v626_v45 }
 0x19b   :  { %586 = vmatprep.subr.bf16.mxu1 %v627_v46 }
 0x19e   :  { %587 = vmatpush3.bf16.msra.mxu1 %v627_v46 }
 0x19f   :  { %588 = vmatprep.subr.bf16.mxu1 %v628_v47 }
 0x1a2   :  { %589 = vmatpush3.bf16.msra.mxu1 %v628_v47 }
 0x1a3   :  { %590 = vmatprep.subr.bf16.mxu1 %v629_v48 }
 0x1a6   :  { %591 = vmatpush3.bf16.msra.mxu1 %v629_v48 }
 0x1a7   :  { %592 = vmatprep.subr.bf16.mxu1 %v630_v49 }
 0x1aa   :  { %593 = vmatpush3.bf16.msra.mxu1 %v630_v49 }
 0x1ad   :  { %595 = vmatmul.mubr.bf16.vlgmr.msra.gmra.mrb[0].mxu1 %v632_v50 }
 0x280   :  { %v596_v52 = vpop.f32.mrb[0].mxu1 }
 0x281   :  { %v465_v53 = vadd.f32 %v596_v52, %v507_v51  ;;  %v441_v54 = vpop.f32.mrb[1].mxu1 }
 0x282   :  { %v463_v55 = vadd.f32 %v507_v51, %v441_v54  ;;  %v597_v56 = vpop.f32.mrb[2].mxu1 }
 0x283   :  { %v469_v57 = vmax.f32 %v465_v53, 0.0  ;;  %v466_v58 = vadd.f32 %v597_v56, %v507_v51  ;;  %v444_v59 = vpop.f32.mrb[3].mxu1 }
 0x284   :  { %v467_v60 = vmax.f32 %v463_v55, 0.0  ;;  %v464_v61 = vadd.f32 %v507_v51, %v444_v59 }
 0x285   :  { %473 = vst [vmem:[%s782_s6 + $0x10] sm:$0xff] %v469_v57  ;;  %v470_v62 = vmax.f32 %v466_v58, 0.0 }
 0x286   :  { %471 = vst [vmem:[%s782_s6] sm:$0xff] %v467_v60  ;;  %v468_v63 = vmax.f32 %v464_v61, 0.0 }
 0x287   :  { %474 = vst [vmem:[%s782_s6 + $0x18] sm:$0xff] %v470_v62 }
 0x288   :  { %472 = vst [vmem:[%s782_s6 + $0x8] sm:$0xff] %v468_v63 }

// kernel: dist_sage_forward.4
= control target key start
LH: loop header
LB: loop body
LE: loop exit
PB: predicated region body
PF: predicated region fallthrough
CT: control target
= control target key end

     0   :  { %v554_v0 = vmov 0.0   ;;  %vm555_vm0 = vmmov 0   ;;  %v556_v10 = vmov 16   ;;  %s709_s0 = inlined_call_operand.vmem [shape: bf16[128,128], index: 0, kind: input, shape index: {}, may-alias: {0,1}]   ;;  %s710_s2 = inlined_call_operand.vmem [shape: bf16[16,128], index: 2, kind: input, shape index: {}]   ;;  %s711_s3 = inlined_call_operand.vmem [shape: bf16[128,128], index: 3, kind: input, shape index: {}]   ;;  %s712_s4 = inlined_call_operand.vmem [shape: bf16[128,128], index: 4, kind: input, shape index: {}]   ;;  %s713_s1 = inlined_call_operand.vmem [shape: bf16[128,128], index: 1, kind: input, shape index: {}, may-alias: {0,1}]   ;;  %s714_s5 = inlined_call_operand.vmem [shape: f32[1,128], index: 5, kind: input, shape index: {}]   ;;  %s715_s6 = inlined_call_operand.vmem [shape: f32[16,128], index: 6, kind: output, shape index: {}]  }
   0x1   :  { %460 = vmatprep.subr.bf16.mxu0 %v554_v0  ;;  %v524_v1 = vld [vmem:[%s709_s0] sm:$0xff]   ;;  %476 = vmatprep.mubr.msk.bf16.mxu0 %vm555_vm0, %v554_v0  ;;  %v525_v2 = vld [vmem:[%s709_s0 + $0x8] sm:$0xff]   ;;  %v526_v3 = vld [vmem:[%s709_s0 + $0x10] sm:$0xff]  }
   0x2   :  { %480 = vmatprep.subr.bf16.mxu1 %v554_v0  ;;  %496 = vmatprep.mubr.msk.bf16.mxu1 %vm555_vm0, %v554_v0  ;;  %v527_v4 = vld [vmem:[%s709_s0 + $0x18] sm:$0xff]   ;;  %v528_v5 = vld [vmem:[%s709_s0 + $0x20] sm:$0xff]   ;;  %v529_v6 = vld [vmem:[%s709_s0 + $0x28] sm:$0xff]  }
   0x3   :  { %461 = vmatpush3.bf16.msra.mxu0 %v524_v1  ;;  %v530_v7 = vld [vmem:[%s709_s0 + $0x30] sm:$0xff]   ;;  %v531_v8 = vld [vmem:[%s709_s0 + $0x38] sm:$0xff]   ;;  %v532_v9 = vld [vmem:[%s710_s2] sm:$0xff]   ;;  %523 = vset.pattern.permute.xlu0 %v556_v10 }
   0x4   :  { %462 = vmatprep.subr.bf16.mxu0 %v554_v0  ;;  %v533_v11 = vld [vmem:[%s711_s3] sm:$0xff]   ;;  %v535_v13 = vld [vmem:[%s711_s3 + $0x8] sm:$0xff]   ;;  %v537_v15 = vld [vmem:[%s711_s3 + $0x10] sm:$0xff]  }
   0x5   :  { %v534_v12 = vld [vmem:[%s712_s4] sm:$0xff]   ;;  %v536_v14 = vld [vmem:[%s712_s4 + $0x8] sm:$0xff]   ;;  %v538_v16 = vld [vmem:[%s712_s4 + $0x10] sm:$0xff]  }
   0x6   :  { %481 = vmatpush3.bf16.msra.mxu1 %v534_v12  ;;  %v539_v17 = vld [vmem:[%s711_s3 + $0x18] sm:$0xff]   ;;  %v541_v19 = vld [vmem:[%s711_s3 + $0x20] sm:$0xff]   ;;  %v543_v21 = vld [vmem:[%s711_s3 + $0x28] sm:$0xff]  }
   0x7   :  { %463 = vmatpush3.bf16.msra.mxu0 %v525_v2  ;;  %482 = vmatprep.subr.bf16.mxu1 %v554_v0  ;;  %v540_v18 = vld [vmem:[%s712_s4 + $0x18] sm:$0xff]   ;;  %v542_v20 = vld [vmem:[%s712_s4 + $0x20] sm:$0xff]   ;;  %v544_v22 = vld [vmem:[%s712_s4 + $0x28] sm:$0xff]  }
   0x8   :  { %464 = vmatprep.subr.bf16.mxu0 %v554_v0  ;;  %v545_v23 = vld [vmem:[%s711_s3 + $0x30] sm:$0xff]   ;;  %v547_v32 = vld [vmem:[%s711_s3 + $0x38] sm:$0xff]   ;;  %v549_v35 = vld [vmem:[%s713_s1] sm:$0xff]  }
   0x9   :  { %v546_v31 = vld [vmem:[%s712_s4 + $0x30] sm:$0xff]   ;;  %v548_v34 = vld [vmem:[%s712_s4 + $0x38] sm:$0xff]   ;;  %v432_v46 = vld [vmem:[%s714_s5] ss:$0 sm:$0xff] }
   0xa   :  { %483 = vmatpush3.bf16.msra.mxu1 %v536_v14 }
   0xb   :  { %465 = vmatpush3.bf16.msra.mxu0 %v526_v3  ;;  %484 = vmatprep.subr.bf16.mxu1 %v554_v0 }
   0xc   :  { %466 = vmatprep.subr.bf16.mxu0 %v554_v0 }
   0xe   :  { %485 = vmatpush3.bf16.msra.mxu1 %v538_v16 }
   0xf   :  { %467 = vmatpush3.bf16.msra.mxu0 %v527_v4  ;;  %486 = vmatprep.subr.bf16.mxu1 %v554_v0 }
  0x10   :  { %468 = vmatprep.subr.bf16.mxu0 %v554_v0 }
  0x12   :  { %487 = vmatpush3.bf16.msra.mxu1 %v540_v18 }
  0x13   :  { %469 = vmatpush3.bf16.msra.mxu0 %v528_v5  ;;  %488 = vmatprep.subr.bf16.mxu1 %v554_v0 }
  0x14   :  { %470 = vmatprep.subr.bf16.mxu0 %v554_v0 }
  0x16   :  { %489 = vmatpush3.bf16.msra.mxu1 %v542_v20 }
  0x17   :  { %471 = vmatpush3.bf16.msra.mxu0 %v529_v6  ;;  %490 = vmatprep.subr.bf16.mxu1 %v554_v0 }
  0x18   :  { %472 = vmatprep.subr.bf16.mxu0 %v554_v0 }
  0x1a   :  { %491 = vmatpush3.bf16.msra.mxu1 %v544_v22 }
  0x1b   :  { %473 = vmatpush3.bf16.msra.mxu0 %v530_v7  ;;  %492 = vmatprep.subr.bf16.mxu1 %v554_v0 }
  0x1c   :  { %474 = vmatprep.subr.bf16.mxu0 %v554_v0 }
  0x1e   :  { %493 = vmatpush3.bf16.msra.mxu1 %v546_v31 }
  0x1f   :  { %475 = vmatpush3.bf16.msra.mxu0 %v531_v8  ;;  %494 = vmatprep.subr.bf16.mxu1 %v554_v0 }
  0x20   :  { %500 = vmatprep.subr.bf16.mxu0 %v554_v0 }
  0x22   :  { %477 = vmatmul.mubr.bf16.vlgmr.msra.gmra.mrb[0].mxu0 %v532_v9  ;;  %495 = vmatpush3.bf16.msra.mxu1 %v548_v34 }
  0x23   :  { %516 = vmatprep.mubr.msk.bf16.mxu0 %vm555_vm0, %v554_v0  ;;  %501 = vmatpush3.bf16.msra.mxu0 %v533_v11 }
  0x24   :  { %502 = vmatprep.subr.bf16.mxu0 %v554_v0 }
  0x27   :  { %503 = vmatpush3.bf16.msra.mxu0 %v535_v13 }
  0x28   :  { %504 = vmatprep.subr.bf16.mxu0 %v554_v0 }
  0x2b   :  { %505 = vmatpush3.bf16.msra.mxu0 %v537_v15 }
  0x2c   :  { %506 = vmatprep.subr.bf16.mxu0 %v554_v0 }
  0x2f   :  { %507 = vmatpush3.bf16.msra.mxu0 %v539_v17 }
  0x30   :  { %508 = vmatprep.subr.bf16.mxu0 %v554_v0 }
  0x33   :  { %509 = vmatpush3.bf16.msra.mxu0 %v541_v19 }
  0x34   :  { %510 = vmatprep.subr.bf16.mxu0 %v554_v0 }
  0x37   :  { %511 = vmatpush3.bf16.msra.mxu0 %v543_v21 }
  0x38   :  { %512 = vmatprep.subr.bf16.mxu0 %v554_v0 }
  0x3b   :  { %513 = vmatpush3.bf16.msra.mxu0 %v545_v23 }
  0x3c   :  { %514 = vmatprep.subr.bf16.mxu0 %v554_v0 }
  0x3f   :  { %515 = vmatpush3.bf16.msra.mxu0 %v547_v32 }
  0x42   :  { %517 = vmatmul.mubr.bf16.vlgmr.msra.gmra.mrb[4].mxu0 %v549_v35 }
  0xf5   :  { %v138_v24 = vpop.f32.mrb[0].mxu0 }
  0xf6   :  { %v154_v25 = vmax.f32 %v138_v24, 1.0  ;;  %v478_v26 = vpop.f32.mrb[1].mxu0 }
  0xf7   :  { %v141_v27 = vpop.f32.mrb[2].mxu0 }
  0xf8   :  { %550 = vrcp.f32 %v154_v25  ;;  %v155_v28 = vmax.f32 %v141_v27, 1.0  ;;  %v479_v29 = vpop.f32.mrb[3].mxu0 }
  0xfa   :  { %552 = vrcp.f32 %v155_v28 }
 0x102   :  { %v551_v30 = vpop.eup %550 }
 0x103   :  { %160 = vperm.xlu0 %523, %v551_v30  }
 0x104   :  { %v553_v33 = vpop.eup %552 }
 0x107   :  { %165 = vperm.xlu0 %523, %v553_v33  }
 0x115   :  { %v382_v41 = vpop.f32.mrb[4].mxu0 }
 0x116   :  { %v518_v42 = vpop.f32.mrb[5].mxu0 }
 0x117   :  { %v385_v43 = vpop.f32.mrb[6].mxu0 }
 0x118   :  { %v519_v44 = vpop.f32.mrb[7].mxu0 }
 0x182   :  { %v161_v36 = vpop.permute.xlu0 %160 }
 0x183   :  { %v168_v38 = vmul.f32 %v161_v36, %v138_v24 }
 0x186   :  { %v166_v37 = vpop.permute.xlu0 %165 }
 0x187   :  { %v169_v39 = vmul.f32 %v166_v37, %v141_v27 }
 0x189   :  { %v188_v40 = vpack.c.bf16 %v169_v39, %v168_v38 }
 0x18b   :  { %497 = vmatmul.mubr.bf16.vlgmr.msra.gmra.mrb[0].mxu1 %v188_v40 }
 0x25e   :  { %v287_v45 = vpop.f32.mrb[0].mxu1 }
 0x25f   :  { %v383_v47 = vadd.f32 %v382_v41, %v287_v45  ;;  %v498_v48 = vpop.f32.mrb[1].mxu1 }
 0x260   :  { %v290_v49 = vpop.f32.mrb[2].mxu1 }
 0x261   :  { %v396_v50 = vadd.f32 %v432_v46, %v383_v47  ;;  %v386_v51 = vadd.f32 %v385_v43, %v290_v49  ;;  %v499_v52 = vpop.f32.mrb[3].mxu1 }
 0x263   :  { %v398_v53 = vmax.f32 %v396_v50, 0.0  ;;  %v397_v54 = vadd.f32 %v432_v46, %v386_v51 }
 0x265   :  { %400 = vst [vmem:[%s715_s6] sm:$0xff] %v398_v53  ;;  %v399_v55 = vmax.f32 %v397_v54, 0.0 }
 0x267   :  { %401 = vst [vmem:[%s715_s6 + $0x8] sm:$0xff] %v399_v55 }

// kernel: dist_sage_forward.5
= control target key start
LH: loop header
LB: loop body
LE: loop exit
PB: predicated region body
PF: predicated region fallthrough
CT: control target
= control target key end

     0   :  { %v550_v1 = vmov 0.0   ;;  %vm551_vm0 = vmmov 0   ;;  %s712_s0 = inlined_call_operand.vmem [shape: bf16[128,128], index: 0, kind: input, shape index: {}, may-alias: {0,1}]   ;;  %s713_s1 = inlined_call_operand.vmem [shape: bf16[128,128], index: 1, kind: input, shape index: {}, may-alias: {0,1}]   ;;  %s714_s2 = inlined_call_operand.vmem [shape: bf16[8,128], index: 2, kind: input, shape index: {}]   ;;  %s715_s3 = inlined_call_operand.vmem [shape: bf16[128,128], index: 3, kind: input, shape index: {}]   ;;  %s716_s4 = inlined_call_operand.vmem [shape: bf16[128,128], index: 4, kind: input, shape index: {}]   ;;  %s717_s5 = inlined_call_operand.vmem [shape: f32[1,128], index: 5, kind: input, shape index: {}]   ;;  %s718_s6 = inlined_call_operand.hbm [shape: f32[8,128], index: 6, kind: output, shape index: {}]  }
   0x1   :  { %v500_v0 = vld [vmem:[%s712_s0] sm:$0xff]   ;;  %435 = vmatprep.subr.bf16.mxu0 %v550_v1  ;;  %455 = vmatprep.subr.bf16.mxu1 %v550_v1  ;;  %v501_v2 = vld [vmem:[%s712_s0 + $0x8] sm:$0xff]   ;;  %v502_v3 = vld [vmem:[%s712_s0 + $0x10] sm:$0xff]  }
   0x2   :  { %436 = vmatpush3.bf16.msra.mxu0 %v500_v0  ;;  %451 = vmatprep.mubr.msk.bf16.mxu0 %vm551_vm0, %v550_v1  ;;  %v503_v4 = vld [vmem:[%s712_s0 + $0x18] sm:$0xff]   ;;  %v504_v5 = vld [vmem:[%s712_s0 + $0x20] sm:$0xff]   ;;  %v505_v6 = vld [vmem:[%s712_s0 + $0x28] sm:$0xff]  }
   0x3   :  { %437 = vmatprep.subr.bf16.mxu0 %v550_v1  ;;  %471 = vmatprep.mubr.msk.bf16.mxu1 %vm551_vm0, %v550_v1 }
   0x6   :  { %438 = vmatpush3.bf16.msra.mxu0 %v501_v2 }
   0x7   :  { %439 = vmatprep.subr.bf16.mxu0 %v550_v1 }
   0xa   :  { %440 = vmatpush3.bf16.msra.mxu0 %v502_v3 }
   0xb   :  { %441 = vmatprep.subr.bf16.mxu0 %v550_v1 }
   0xe   :  { %442 = vmatpush3.bf16.msra.mxu0 %v503_v4 }
   0xf   :  { %443 = vmatprep.subr.bf16.mxu0 %v550_v1 }
  0x12   :  { %444 = vmatpush3.bf16.msra.mxu0 %v504_v5 }
  0x13   :  { %445 = vmatprep.subr.bf16.mxu0 %v550_v1 }
  0x14   :  { %11 = vsyncpa [#allocation4], 0  ;;  %v506_v7 = vld [vmem:[%s712_s0 + $0x30] sm:$0xff]   ;;  %v507_v8 = vld [vmem:[%s712_s0 + $0x38] sm:$0xff]   ;;  %v552_v10 = vmov 16  }
  0x15   :  { %v31_v9 = vld [vmem:[%s714_s2] sm:$0xf]  ;;  %499 = vset.pattern.permute.xlu0 %v552_v10  ;;  %v510_v13 = vld [vmem:[%s715_s3 + $0x8] sm:$0xff]   ;;  %v512_v15 = vld [vmem:[%s715_s3 + $0x10] sm:$0xff]  }
  0x16   :  { %446 = vmatpush3.bf16.msra.mxu0 %v505_v6  ;;  %v508_v11 = vld [vmem:[%s715_s3] sm:$0xff]   ;;  %v511_v14 = vld [vmem:[%s716_s4 + $0x8] sm:$0xff]   ;;  %v513_v16 = vld [vmem:[%s716_s4 + $0x10] sm:$0xff]  }
  0x17   :  { %447 = vmatprep.subr.bf16.mxu0 %v550_v1  ;;  %v509_v12 = vld [vmem:[%s716_s4] sm:$0xff]   ;;  %v514_v17 = vld [vmem:[%s715_s3 + $0x18] sm:$0xff]   ;;  %v518_v21 = vld [vmem:[%s715_s3 + $0x28] sm:$0xff]  }
  0x18   :  { %456 = vmatpush3.bf16.msra.mxu1 %v509_v12  ;;  %v515_v18 = vld [vmem:[%s716_s4 + $0x18] sm:$0xff]   ;;  %v516_v19 = vld [vmem:[%s715_s3 + $0x20] sm:$0xff]   ;;  %v519_v22 = vld [vmem:[%s716_s4 + $0x28] sm:$0xff]  }
  0x19   :  { %457 = vmatprep.subr.bf16.mxu1 %v550_v1  ;;  %v517_v20 = vld [vmem:[%s716_s4 + $0x20] sm:$0xff]   ;;  %v520_v23 = vld [vmem:[%s715_s3 + $0x30] sm:$0xff]   ;;  %v522_v25 = vld [vmem:[%s715_s3 + $0x38] sm:$0xff]  }
  0x1a   :  { %448 = vmatpush3.bf16.msra.mxu0 %v506_v7  ;;  %v521_v24 = vld [vmem:[%s716_s4 + $0x30] sm:$0xff]   ;;  %v523_v32 = vld [vmem:[%s716_s4 + $0x38] sm:$0xff]   ;;  %v150_v33 = vld [vmem:[%s713_s1] sm:$0xf]  ;;  %s553_s4 = smov [#allocation3]  }
  0x1b   :  { %449 = vmatprep.subr.bf16.mxu0 %v550_v1  ;;  %v407_v42 = vld [vmem:[%s717_s5] ss:$0 sm:$0xff]  ;;  %s375_s22 = sshll.u32 %s553_s4, 4  ;;  %s376_s22 = int_to_ptr.vmem [resolvable:$true] %s375_s22 }
  0x1c   :  { %458 = vmatpush3.bf16.msra.mxu1 %v511_v14  ;;  %s526_s1 = scalar_lea.vmem %s376_s22, 128  ;;  %p531_p1 = scmp.lt.s32.totalorder %s376_s22, %s376_s22 }
  0x1d   :  { %459 = vmatprep.subr.bf16.mxu1 %v550_v1  ;;  %p527_p0 = scmp.ne.s32.totalorder %s376_s22, %s526_s1  ;;  %p532_p2 = scmp.lt.s32.totalorder %s526_s1, %s526_s1 }
  0x1e   :  { %450 = vmatpush3.bf16.msra.mxu0 %v507_v8 }
  0x1f   :  { %475 = vmatprep.subr.bf16.mxu0 %v550_v1  ;;  %p533_p3 = por %p532_p2, %p531_p1 }
  0x20   :  { %460 = vmatpush3.bf16.msra.mxu1 %v513_v16 }
  0x21   :  { %452 = vmatmul.mubr.bf16.vlgmr.msra.gmra.mrb[0].mxu0 %v31_v9  ;;  %461 = vmatprep.subr.bf16.mxu1 %v550_v1  ;;  %p534_p4 = pnand %p533_p3, %p527_p0 }
  0x22   :  { %491 = vmatprep.mubr.msk.bf16.mxu0 %vm551_vm0, %v550_v1  ;;  %476 = vmatpush3.bf16.msra.mxu0 %v508_v11 }
  0x23   :  { %477 = vmatprep.subr.bf16.mxu0 %v550_v1 }
  0x24   :  { %462 = vmatpush3.bf16.msra.mxu1 %v515_v18 }
  0x25   :  { %463 = vmatprep.subr.bf16.mxu1 %v550_v1 }
  0x26   :  { %478 = vmatpush3.bf16.msra.mxu0 %v510_v13 }
  0x27   :  { %479 = vmatprep.subr.bf16.mxu0 %v550_v1 }
  0x28   :  { %464 = vmatpush3.bf16.msra.mxu1 %v517_v20 }
  0x29   :  { %465 = vmatprep.subr.bf16.mxu1 %v550_v1 }
  0x2a   :  { %480 = vmatpush3.bf16.msra.mxu0 %v512_v15 }
  0x2b   :  { %481 = vmatprep.subr.bf16.mxu0 %v550_v1 }
  0x2c   :  { %466 = vmatpush3.bf16.msra.mxu1 %v519_v22 }
  0x2d   :  { %467 = vmatprep.subr.bf16.mxu1 %v550_v1 }
  0x2e   :  { %482 = vmatpush3.bf16.msra.mxu0 %v514_v17 }
  0x2f   :  { %483 = vmatprep.subr.bf16.mxu0 %v550_v1 }
  0x30   :  { %468 = vmatpush3.bf16.msra.mxu1 %v521_v24 }
  0x31   :  { %469 = vmatprep.subr.bf16.mxu1 %v550_v1 }
  0x32   :  { %484 = vmatpush3.bf16.msra.mxu0 %v516_v19 }
  0x33   :  { %485 = vmatprep.subr.bf16.mxu0 %v550_v1 }
  0x34   :  { %470 = vmatpush3.bf16.msra.mxu1 %v523_v32 }
  0x36   :  { %486 = vmatpush3.bf16.msra.mxu0 %v518_v21 }
  0x37   :  { %487 = vmatprep.subr.bf16.mxu0 %v550_v1 }
  0x3a   :  { %488 = vmatpush3.bf16.msra.mxu0 %v520_v23 }
  0x3b   :  { %489 = vmatprep.subr.bf16.mxu0 %v550_v1 }
  0x3e   :  { %490 = vmatpush3.bf16.msra.mxu0 %v522_v25 }
  0x41   :  { %492 = vmatmul.mubr.bf16.vlgmr.msra.gmra.mrb[4].mxu0 %v150_v33 }
  0xf4   :  { %v130_v26 = vpop.f32.mrb[0].mxu0 }
  0xf5   :  { %v142_v27 = vmax.f32 %v130_v26, 1.0  ;;  %v453_v28 = vpop.f32.mrb[1].mxu0 }
  0xf6   :  { %v133_v29 = vpop.f32.mrb[2].mxu0 }
  0xf7   :  { %524 = vrcp.f32 %v142_v27  ;;  %v454_v30 = vpop.f32.mrb[3].mxu0 }
 0x101   :  { %v525_v31 = vpop.eup %524 }
 0x102   :  { %146 = vperm.xlu0 %499, %v525_v31  }
 0x114   :  { %v354_v37 = vpop.f32.mrb[4].mxu0 }
 0x115   :  { %v493_v38 = vpop.f32.mrb[5].mxu0 }
 0x116   :  { %v357_v39 = vpop.f32.mrb[6].mxu0 }
 0x117   :  { %v494_v40 = vpop.f32.mrb[7].mxu0 }
 0x181   :  { %v147_v34 = vpop.permute.xlu0 %146 }
 0x182   :  { %v149_v35 = vmul.f32 %v147_v34, %v130_v26 }
 0x184   :  { %v167_v36 = vpack.c.bf16 %v149_v35, %v149_v35 }
 0x186   :  { %472 = vmatmul.mubr.bf16.vlgmr.msra.gmra.mrb[0].mxu1 %v167_v36 }
 0x259   :  { %v266_v41 = vpop.f32.mrb[0].mxu1 }
 0x25a   :  { %v355_v43 = vadd.f32 %v354_v37, %v266_v41  ;;  %v473_v44 = vpop.f32.mrb[1].mxu1 }
 0x25b   :  { %v269_v45 = vpop.f32.mrb[2].mxu1 }
 0x25c   :  { %v474_v46 = vpop.f32.mrb[3].mxu1  ;;  %v367_v47 = vadd.f32 %v407_v42, %v355_v43 }
 0x25e   :  { %368 = vst [vmem:[#allocation3] sm:$0xff] %v367_v47 }
 0x25f   :  { %537 = shalt.err (!%p534_p4)
}
 0x260   :  { %s538_s5 = scalar_lea.hbm %s718_s6, 128 }
 0x261   :  { %p539_p5 = scmp.ne.s32.totalorder %s718_s6, %s538_s5  ;;  %p542_p6 = scmp.lt.u32.totalorder %s538_s5, %s718_s6 }
 0x263   :  { %p544_p7 = pnand %p542_p6, %p539_p5 }
 0x265   :  { %547 = shalt.err (!%p544_p7)
}
 0x266   :  { %378 = dma.vmem_to_hbm [thread:$0]  %s376_s22, 128, %s718_s6, [#allocation4]  }
 0x267   :  { %548 = dma.done.wait [#allocation4], 128  }
 0x268   :  { %549 = vsyncadd [#allocation4], 4294967168 }
 0x269   :  { %382 = vsyncpa [#allocation4], 1 }

</bundles_post_ra>
